<compile_context>
chip_gen: v6e
topology: v6e:2x2x1
jax: 0.10.0
libtpu: 0.0.40
codegen_flags: <defaults>
</compile_context>

<pallas_src>
import jax
import jax.numpy as jnp
from jax.experimental import pallas as pl
from jax.experimental.pallas import tpu as pltpu

H_IN, H_HID, H_OUT = 1, 200, 784
H_HID_PAD = 256   # 2 * 128 lanes, MXU-aligned K
TB_CAP = 512      # batch rows per grid step


def _round_up(n, m):
    return ((n + m - 1) // m) * m


def generator_kernel(x_ref, w1_ref, b1_ref, w2_ref, b2_ref, o_ref):
    # Layer 1: (TB, 1) x (1, 256) outer-product broadcast on the VPU
    # (no MXU push/pop for a K=1 "matmul").
    x = x_ref[...]                                      # (TB, 1)
    h = jax.nn.sigmoid(x * w1_ref[...] + b1_ref[...])   # (TB, 256), EUP exp path
    # Layer 2: MXU matmul, K=256 aligned, N=784 (Mosaic masks the last lanes).
    y = jnp.dot(h, w2_ref[...], preferred_element_type=jnp.float32)
    o_ref[...] = jax.nn.sigmoid(y + b2_ref[...])        # (TB, 784)


def pad_params(w1, b1, w2, b2):
    """Pad params once at init time (kernel layout: w (in, out), b (1, out)).

    Only the hidden dim is padded 200 -> 256.  The extra 56 rows of w2 are
    zeros so the padded hidden units (sigmoid(0) = 0.5) contribute nothing.
    Output dim stays at 784 so the kernel writes the final shape directly.
    """
    w1p = jnp.zeros((1, H_HID_PAD), jnp.float32).at[:, :H_HID].set(w1)
    b1p = jnp.zeros((1, H_HID_PAD), jnp.float32).at[:, :H_HID].set(b1)
    w2p = jnp.zeros((H_HID_PAD, H_OUT), jnp.float32).at[:H_HID, :].set(w2)
    b2p = b2.astype(jnp.float32).reshape(1, H_OUT)
    return w1p, b1p, w2p, b2p


def generator_forward(x, w1p, b1p, w2p, b2p):
    """x: (B, 1) float32; padded params from pad_params. Returns (B, 784) f32."""
    B = x.shape[0]
    TB = min(TB_CAP, _round_up(B, 8))      # multiple of 8 sublanes
    grid = (pl.cdiv(B, TB),)               # ragged last block handled by Pallas

    return pl.pallas_call(
        generator_kernel,
        out_shape=jax.ShapeDtypeStruct((B, H_OUT), jnp.float32),
        grid=grid,
        in_specs=[
            pl.BlockSpec((TB, 1), lambda i: (i, 0)),              # x: tiled on batch
            pl.BlockSpec((1, H_HID_PAD), lambda i: (0, 0)),       # w1: resident
            pl.BlockSpec((1, H_HID_PAD), lambda i: (0, 0)),       # b1: resident
            pl.BlockSpec((H_HID_PAD, H_OUT), lambda i: (0, 0)),   # w2: resident
            pl.BlockSpec((1, H_OUT), lambda i: (0, 0)),           # b2: resident
        ],
        out_specs=pl.BlockSpec((TB, H_OUT), lambda i: (i, 0)),
        compiler_params=pltpu.CompilerParams(
            dimension_semantics=("parallel",),
            vmem_limit_bytes=32 * 1024 * 1024,
        ),
    )(x, w1p, b1p, w2p, b2p)


def init_params(key):
    """Match PyTorch nn.Linear init: uniform(-1/sqrt(in), 1/sqrt(in)).

    Returned in kernel layout: w (in, out), b (1, out).
    """
    k1, k2, k3, k4 = jax.random.split(key, 4)
    bound1 = 1.0 / jnp.sqrt(H_IN)
    bound2 = 1.0 / jnp.sqrt(H_HID)
    w1 = jax.random.uniform(k1, (H_IN, H_HID), jnp.float32, -bound1, bound1)
    b1 = jax.random.uniform(k2, (1, H_HID), jnp.float32, -bound1, bound1)
    w2 = jax.random.uniform(k3, (H_HID, H_OUT), jnp.float32, -bound2, bound2)
    b2 = jax.random.uniform(k4, (1, H_OUT), jnp.float32, -bound2, bound2)
    return w1, b1, w2, b2


def generator_reference(x, w1, b1, w2, b2):
    h = jax.nn.sigmoid(x @ w1 + b1)
    return jax.nn.sigmoid(h @ w2 + b2)


if __name__ == "__main__":
    key = jax.random.PRNGKey(0)
    pkey, k8, k37, k530 = jax.random.split(key, 4)
    w1, b1, w2, b2 = init_params(pkey)
    w1p, b1p, w2p, b2p = pad_params(w1, b1, w2, b2)

    # Small batch (matches the module's (B, 1) latent input), grid=(1,).
    x = jax.random.uniform(k8, (8, 1), jnp.float32)
    out = jax.block_until_ready(generator_forward(x, w1p, b1p, w2p, b2p))
    ref = generator_reference(x, w1, b1, w2, b2)
    assert out.shape == (8, H_OUT)
    assert jnp.allclose(out, ref, atol=1e-5, rtol=1e-5)

    # Non-multiple-of-8 batch: exercises the ragged (masked) last block.
    x2 = jax.random.uniform(k37, (37, 1), jnp.float32)
    out2 = jax.block_until_ready(generator_forward(x2, w1p, b1p, w2p, b2p))
    ref2 = generator_reference(x2, w1, b1, w2, b2)
    assert out2.shape == (37, H_OUT)
    assert jnp.allclose(out2, ref2, atol=1e-5, rtol=1e-5)

    # Multi-step grid with a ragged last block (530 rows, TB=512, grid=(2,)).
    x3 = jax.random.uniform(k530, (530, 1), jnp.float32)
    out3 = jax.block_until_ready(generator_forward(x3, w1p, b1p, w2p, b2p))
    ref3 = generator_reference(x3, w1, b1, w2, b2)
    assert out3.shape == (530, H_OUT)
    assert jnp.allclose(out3, ref3, atol=1e-5, rtol=1e-5)

    print("KERNEL_OK")
</pallas_src>

<mosaic_0001>
module attributes {stable_mosaic.version = 11 : i64} {
  func.func @generator_kernel(%arg0: i32, %arg1: memref<8x1xf32, #tpu.memory_space<vmem>>, %arg2: memref<1x256xf32, #tpu.memory_space<vmem>>, %arg3: memref<1x256xf32, #tpu.memory_space<vmem>>, %arg4: memref<256x784xf32, #tpu.memory_space<vmem>>, %arg5: memref<1x784xf32, #tpu.memory_space<vmem>>, %arg6: memref<8x784xf32, #tpu.memory_space<vmem>>) attributes {dimension_semantics = [#tpu.dimension_semantics<parallel>], iteration_bounds = array<i64: 1>, scalar_prefetch = 0 : i64, scratch_operands = 0 : i64, tpu.core_type = #tpu.core_type<tc>, window_params = [{transform_indices = @transform_0, window_bounds = array<i64: 8, 1>}, {pipeline_mode = #tpu.pipeline_mode<synchronous>, transform_indices = @transform_1, window_bounds = array<i64: 1, 256>}, {pipeline_mode = #tpu.pipeline_mode<synchronous>, transform_indices = @transform_2, window_bounds = array<i64: 1, 256>}, {pipeline_mode = #tpu.pipeline_mode<synchronous>, transform_indices = @transform_3, window_bounds = array<i64: 256, 784>}, {pipeline_mode = #tpu.pipeline_mode<synchronous>, transform_indices = @transform_4, window_bounds = array<i64: 1, 784>}, {transform_indices = @transform_5, window_bounds = array<i64: 8, 784>}]} {
    %c0 = arith.constant 0 : index
    %c0_0 = arith.constant 0 : index
    %0 = vector.load %arg1[%c0, %c0_0] : memref<8x1xf32, #tpu.memory_space<vmem>>, vector<8x1xf32>
    %c0_1 = arith.constant 0 : index
    %c0_2 = arith.constant 0 : index
    %1 = vector.load %arg2[%c0_1, %c0_2] : memref<1x256xf32, #tpu.memory_space<vmem>>, vector<1x256xf32>
    %2 = vector.broadcast %0 : vector<8x1xf32> to vector<8x256xf32>
    %3 = vector.broadcast %1 : vector<1x256xf32> to vector<8x256xf32>
    %4 = arith.mulf %2, %3 : vector<8x256xf32>
    %c0_3 = arith.constant 0 : index
    %c0_4 = arith.constant 0 : index
    %5 = vector.load %arg3[%c0_3, %c0_4] : memref<1x256xf32, #tpu.memory_space<vmem>>, vector<1x256xf32>
    %6 = vector.broadcast %5 : vector<1x256xf32> to vector<8x256xf32>
    %7 = arith.addf %4, %6 : vector<8x256xf32>
    %8 = arith.negf %7 : vector<8x256xf32>
    %9 = math.exp %8 : vector<8x256xf32>
    %cst = arith.constant 1.000000e+00 : f32
    %10 = vector.broadcast %cst : f32 to vector<8x256xf32>
    %11 = arith.addf %10, %9 : vector<8x256xf32>
    %12 = arith.divf %10, %11 : vector<8x256xf32>
    %c0_5 = arith.constant 0 : index
    %c0_6 = arith.constant 0 : index
    %13 = vector.load %arg4[%c0_5, %c0_6] : memref<256x784xf32, #tpu.memory_space<vmem>>, vector<256x784xf32>
    %cst_7 = arith.constant dense<0.000000e+00> : vector<8x784xf32>
    %14 = tpu.matmul %12, %13, %cst_7 {dimension_numbers = #tpu.dot_dimension_numbers<[1], [0], [0], [1], [0, 0, 1, 1], [], []>} : vector<8x256xf32>, vector<256x784xf32>, vector<8x784xf32> -> vector<8x784xf32>
    %c0_8 = arith.constant 0 : index
    %c0_9 = arith.constant 0 : index
    %15 = vector.load %arg5[%c0_8, %c0_9] : memref<1x784xf32, #tpu.memory_space<vmem>>, vector<1x784xf32>
    %16 = vector.broadcast %15 : vector<1x784xf32> to vector<8x784xf32>
    %17 = arith.addf %14, %16 : vector<8x784xf32>
    %18 = arith.negf %17 : vector<8x784xf32>
    %19 = math.exp %18 : vector<8x784xf32>
    %cst_10 = arith.constant 1.000000e+00 : f32
    %20 = vector.broadcast %cst_10 : f32 to vector<8x784xf32>
    %21 = arith.addf %20, %19 : vector<8x784xf32>
    %22 = arith.divf %20, %21 : vector<8x784xf32>
    %c0_11 = arith.constant 0 : index
    %c0_12 = arith.constant 0 : index
    %23 = vector.load %arg6[%c0_11, %c0_12] : memref<8x784xf32, #tpu.memory_space<vmem>>, vector<8x784xf32>
    tpu.vector_store %arg6[%c0_11, %c0_12], %22 {strides = array<i32>} : memref<8x784xf32, #tpu.memory_space<vmem>>, vector<8x784xf32>,
    return
  }
  func.func @transform_0(%arg0: i32) -> (i32, i32) {
    %c0_i32 = arith.constant 0 : i32
    %c0_i32_0 = arith.constant 0 : i32
    return %arg0, %c0_i32 : i32, i32
  }
  func.func @transform_1(%arg0: i32) -> (i32, i32) {
    %c0_i32 = arith.constant 0 : i32
    %c0_i32_0 = arith.constant 0 : i32
    %c0_i32_1 = arith.constant 0 : i32
    return %c0_i32, %c0_i32_0 : i32, i32
  }
  func.func @transform_2(%arg0: i32) -> (i32, i32) {
    %c0_i32 = arith.constant 0 : i32
    %c0_i32_0 = arith.constant 0 : i32
    %c0_i32_1 = arith.constant 0 : i32
    return %c0_i32, %c0_i32_0 : i32, i32
  }
  func.func @transform_3(%arg0: i32) -> (i32, i32) {
    %c0_i32 = arith.constant 0 : i32
    %c0_i32_0 = arith.constant 0 : i32
    %c0_i32_1 = arith.constant 0 : i32
    return %c0_i32, %c0_i32_0 : i32, i32
  }
  func.func @transform_4(%arg0: i32) -> (i32, i32) {
    %c0_i32 = arith.constant 0 : i32
    %c0_i32_0 = arith.constant 0 : i32
    %c0_i32_1 = arith.constant 0 : i32
    return %c0_i32, %c0_i32_0 : i32, i32
  }
  func.func @transform_5(%arg0: i32) -> (i32, i32) {
    %c0_i32 = arith.constant 0 : i32
    %c0_i32_0 = arith.constant 0 : i32
    return %arg0, %c0_i32 : i32, i32
  }
}

</mosaic_0001>

<bundles_post_ra>
// kernel: tpu_custom_call.1
= control target key start
LH: loop header
LB: loop body
LE: loop exit
PB: predicated region body
PF: predicated region fallthrough
CT: control target
= control target key end

     0   :  { %v780_v3 = vmov 0   ;;  %s1524_s0 = inlined_call_operand.vmem [shape: f32[8,1], index: 0, kind: input, shape index: {}]   ;;  %s1525_s1 = inlined_call_operand.vmem [shape: f32[1,256], index: 1, kind: input, shape index: {}]   ;;  %s1526_s2 = inlined_call_operand.vmem [shape: f32[1,256], index: 2, kind: input, shape index: {}]   ;;  %s1527_s3 = inlined_call_operand.vmem [shape: f32[256,784], index: 3, kind: input, shape index: {}]   ;;  %s1528_s4 = inlined_call_operand.vmem [shape: f32[1,784], index: 4, kind: input, shape index: {}]   ;;  %s1529_s5 = inlined_call_operand.hbm [shape: f32[8,784], index: 5, kind: output, shape index: {}]  }
   0x1   :  { %v21_v0 = vld [vmem:[%s1524_s0] sm:$0xff]  ;;  %v173_v1 = vld [vmem:[%s1527_s3 + $0x350] sm:$0xff]  ;;  %721 = vset.pattern.permute.xlu0 %v780_v3  ;;  %v172_v4 = vld [vmem:[%s1527_s3 + $0x348] sm:$0xff] }
   0x2   :  { %v175_v2 = vld [vmem:[%s1527_s3 + $0x360] sm:$0xff]  ;;  %328 = vmatprep.subr.mxu0 %v173_v1  ;;  %v174_v5 = vld [vmem:[%s1527_s3 + $0x358] sm:$0xff]  ;;  %25 = vperm.xlu0 %721, %v21_v0   ;;  %v168_v7 = vld [vmem:[%s1527_s3 + $0x328] sm:$0xff] }
   0x3   :  { %v166_v6 = vld [vmem:[%s1527_s3 + $0x318] sm:$0xff]  ;;  %399 = vmatprep.subr.mxu1 %v175_v2  ;;  %v165_v8 = vld [vmem:[%s1527_s3 + $0x310] sm:$0xff]  ;;  %v167_v9 = vld [vmem:[%s1527_s3 + $0x320] sm:$0xff]  ;;  %329 = vmatpush1.msra.mxu0 %v172_v4 }
   0x4   :  { %400 = vmatpush1.msra.mxu1 %v174_v5  ;;  %v159_v10 = vld [vmem:[%s1527_s3 + $0x2e0] sm:$0xff]  ;;  %v161_v11 = vld [vmem:[%s1527_s3 + $0x2f0] sm:$0xff]  ;;  %330 = vmatprep.subr.mxu0 %v166_v6  ;;  %v158_v12 = vld [vmem:[%s1527_s3 + $0x2d8] sm:$0xff] }
   0x5   :  { %401 = vmatprep.subr.mxu1 %v168_v7  ;;  %v160_v13 = vld [vmem:[%s1527_s3 + $0x2e8] sm:$0xff]  ;;  %331 = vmatpush1.msra.mxu0 %v165_v8  ;;  %v154_v15 = vld [vmem:[%s1527_s3 + $0x2b8] sm:$0xff]  ;;  %v151_v16 = vld [vmem:[%s1527_s3 + $0x2a0] sm:$0xff] }
   0x6   :  { %402 = vmatpush1.msra.mxu1 %v167_v9  ;;  %v152_v14 = vld [vmem:[%s1527_s3 + $0x2a8] sm:$0xff]  ;;  %332 = vmatprep.subr.mxu0 %v159_v10  ;;  %v153_v17 = vld [vmem:[%s1527_s3 + $0x2b0] sm:$0xff]  ;;  %v147_v19 = vld [vmem:[%s1527_s3 + $0x280] sm:$0xff] }
   0x7   :  { %403 = vmatprep.subr.mxu1 %v161_v11  ;;  %333 = vmatpush1.msra.mxu0 %v158_v12  ;;  %v145_v18 = vld [vmem:[%s1527_s3 + $0x270] sm:$0xff]  ;;  %v144_v20 = vld [vmem:[%s1527_s3 + $0x268] sm:$0xff]  ;;  %v146_v21 = vld [vmem:[%s1527_s3 + $0x278] sm:$0xff] }
   0x8   :  { %404 = vmatpush1.msra.mxu1 %v160_v13  ;;  %334 = vmatprep.subr.mxu0 %v152_v14  ;;  %v138_v22 = vld [vmem:[%s1527_s3 + $0x238] sm:$0xff]  ;;  %v140_v23 = vld [vmem:[%s1527_s3 + $0x248] sm:$0xff]  ;;  %v137_v24 = vld [vmem:[%s1527_s3 + $0x230] sm:$0xff] }
   0x9   :  { %405 = vmatprep.subr.mxu1 %v154_v15  ;;  %335 = vmatpush1.msra.mxu0 %v151_v16  ;;  %v139_v25 = vld [vmem:[%s1527_s3 + $0x240] sm:$0xff]  ;;  %v133_v27 = vld [vmem:[%s1527_s3 + $0x210] sm:$0xff]  ;;  %v130_v28 = vld [vmem:[%s1527_s3 + $0x1f8] sm:$0xff] }
   0xa   :  { %406 = vmatpush1.msra.mxu1 %v153_v17  ;;  %336 = vmatprep.subr.mxu0 %v145_v18  ;;  %v131_v26 = vld [vmem:[%s1527_s3 + $0x200] sm:$0xff]  ;;  %v132_v29 = vld [vmem:[%s1527_s3 + $0x208] sm:$0xff]  ;;  %v126_v31 = vld [vmem:[%s1527_s3 + $0x1d8] sm:$0xff] }
   0xb   :  { %407 = vmatprep.subr.mxu1 %v147_v19  ;;  %337 = vmatpush1.msra.mxu0 %v144_v20  ;;  %v124_v30 = vld [vmem:[%s1527_s3 + $0x1c8] sm:$0xff]  ;;  %v123_v32 = vld [vmem:[%s1527_s3 + $0x1c0] sm:$0xff]  ;;  %v125_v33 = vld [vmem:[%s1527_s3 + $0x1d0] sm:$0xff] }
   0xc   :  { %408 = vmatpush1.msra.mxu1 %v146_v21  ;;  %338 = vmatprep.subr.mxu0 %v138_v22  ;;  %v117_v34 = vld [vmem:[%s1527_s3 + $0x190] sm:$0xff]  ;;  %v119_v35 = vld [vmem:[%s1527_s3 + $0x1a0] sm:$0xff]  ;;  %v116_v36 = vld [vmem:[%s1527_s3 + $0x188] sm:$0xff] }
   0xd   :  { %409 = vmatprep.subr.mxu1 %v140_v23  ;;  %339 = vmatpush1.msra.mxu0 %v137_v24  ;;  %v118_v37 = vld [vmem:[%s1527_s3 + $0x198] sm:$0xff]  ;;  %v112_v39 = vld [vmem:[%s1527_s3 + $0x168] sm:$0xff]  ;;  %v109_v40 = vld [vmem:[%s1527_s3 + $0x150] sm:$0xff] }
   0xe   :  { %410 = vmatpush1.msra.mxu1 %v139_v25  ;;  %340 = vmatprep.subr.mxu0 %v131_v26  ;;  %v110_v38 = vld [vmem:[%s1527_s3 + $0x158] sm:$0xff]  ;;  %v111_v41 = vld [vmem:[%s1527_s3 + $0x160] sm:$0xff]  ;;  %v105_v43 = vld [vmem:[%s1527_s3 + $0x130] sm:$0xff] }
   0xf   :  { %411 = vmatprep.subr.mxu1 %v133_v27  ;;  %341 = vmatpush1.msra.mxu0 %v130_v28  ;;  %v103_v42 = vld [vmem:[%s1527_s3 + $0x120] sm:$0xff]  ;;  %v102_v44 = vld [vmem:[%s1527_s3 + $0x118] sm:$0xff]  ;;  %v104_v45 = vld [vmem:[%s1527_s3 + $0x128] sm:$0xff] }
  0x10   :  { %412 = vmatpush1.msra.mxu1 %v132_v29  ;;  %342 = vmatprep.subr.mxu0 %v124_v30  ;;  %v96_v46 = vld [vmem:[%s1527_s3 + $0xe8] sm:$0xff]  ;;  %v98_v47 = vld [vmem:[%s1527_s3 + $0xf8] sm:$0xff]  ;;  %v95_v48 = vld [vmem:[%s1527_s3 + $0xe0] sm:$0xff] }
  0x11   :  { %413 = vmatprep.subr.mxu1 %v126_v31  ;;  %343 = vmatpush1.msra.mxu0 %v123_v32  ;;  %v97_v49 = vld [vmem:[%s1527_s3 + $0xf0] sm:$0xff]  ;;  %v91_v51 = vld [vmem:[%s1527_s3 + $0xc0] sm:$0xff]  ;;  %v88_v52 = vld [vmem:[%s1527_s3 + $0xa8] sm:$0xff] }
  0x12   :  { %414 = vmatpush1.msra.mxu1 %v125_v33  ;;  %344 = vmatprep.subr.mxu0 %v117_v34  ;;  %v89_v50 = vld [vmem:[%s1527_s3 + $0xb0] sm:$0xff]  ;;  %v90_v53 = vld [vmem:[%s1527_s3 + $0xb8] sm:$0xff]  ;;  %v84_v55 = vld [vmem:[%s1527_s3 + $0x88] sm:$0xff] }
  0x13   :  { %415 = vmatprep.subr.mxu1 %v119_v35  ;;  %345 = vmatpush1.msra.mxu0 %v116_v36  ;;  %v82_v54 = vld [vmem:[%s1527_s3 + $0x78] sm:$0xff]  ;;  %v81_v56 = vld [vmem:[%s1527_s3 + $0x70] sm:$0xff]  ;;  %v83_v57 = vld [vmem:[%s1527_s3 + $0x80] sm:$0xff] }
  0x14   :  { %416 = vmatpush1.msra.mxu1 %v118_v37  ;;  %346 = vmatprep.subr.mxu0 %v110_v38  ;;  %v75_v58 = vld [vmem:[%s1527_s3 + $0x40] sm:$0xff]  ;;  %v77_v59 = vld [vmem:[%s1527_s3 + $0x50] sm:$0xff]  ;;  %v74_v60 = vld [vmem:[%s1527_s3 + $0x38] sm:$0xff] }
  0x15   :  { %417 = vmatprep.subr.mxu1 %v112_v39  ;;  %347 = vmatpush1.msra.mxu0 %v109_v40  ;;  %v76_v61 = vld [vmem:[%s1527_s3 + $0x48] sm:$0xff]  ;;  %v70_v63 = vld [vmem:[%s1527_s3 + $0x18] sm:$0xff]  ;;  %v67_v0 = vld [vmem:[%s1527_s3] sm:$0xff] }
  0x16   :  { %418 = vmatpush1.msra.mxu1 %v111_v41  ;;  %348 = vmatprep.subr.mxu0 %v103_v42  ;;  %v68_v62 = vld [vmem:[%s1527_s3 + $0x8] sm:$0xff]  ;;  %v69_v1 = vld [vmem:[%s1527_s3 + $0x10] sm:$0xff]  ;;  %v287_v3 = vld [vmem:[%s1527_s3 + $0x6e0] sm:$0xff] }
  0x17   :  { %419 = vmatprep.subr.mxu1 %v105_v43  ;;  %349 = vmatpush1.msra.mxu0 %v102_v44  ;;  %v285_v2 = vld [vmem:[%s1527_s3 + $0x6d0] sm:$0xff]  ;;  %v284_v4 = vld [vmem:[%s1527_s3 + $0x6c8] sm:$0xff]  ;;  %v286_v5 = vld [vmem:[%s1527_s3 + $0x6d8] sm:$0xff] }
  0x18   :  { %420 = vmatpush1.msra.mxu1 %v104_v45  ;;  %350 = vmatprep.subr.mxu0 %v96_v46  ;;  %v278_v6 = vld [vmem:[%s1527_s3 + $0x698] sm:$0xff]  ;;  %v280_v7 = vld [vmem:[%s1527_s3 + $0x6a8] sm:$0xff]  ;;  %v277_v8 = vld [vmem:[%s1527_s3 + $0x690] sm:$0xff] }
  0x19   :  { %421 = vmatprep.subr.mxu1 %v98_v47  ;;  %351 = vmatpush1.msra.mxu0 %v95_v48  ;;  %v279_v9 = vld [vmem:[%s1527_s3 + $0x6a0] sm:$0xff]  ;;  %v273_v11 = vld [vmem:[%s1527_s3 + $0x670] sm:$0xff]  ;;  %v270_v12 = vld [vmem:[%s1527_s3 + $0x658] sm:$0xff] }
  0x1a   :  { %422 = vmatpush1.msra.mxu1 %v97_v49  ;;  %352 = vmatprep.subr.mxu0 %v89_v50  ;;  %v271_v10 = vld [vmem:[%s1527_s3 + $0x660] sm:$0xff]  ;;  %v272_v13 = vld [vmem:[%s1527_s3 + $0x668] sm:$0xff]  ;;  %v266_v15 = vld [vmem:[%s1527_s3 + $0x638] sm:$0xff] }
  0x1b   :  { %423 = vmatprep.subr.mxu1 %v91_v51  ;;  %353 = vmatpush1.msra.mxu0 %v88_v52  ;;  %v264_v14 = vld [vmem:[%s1527_s3 + $0x628] sm:$0xff]  ;;  %v263_v16 = vld [vmem:[%s1527_s3 + $0x620] sm:$0xff]  ;;  %v265_v17 = vld [vmem:[%s1527_s3 + $0x630] sm:$0xff] }
  0x1c   :  { %424 = vmatpush1.msra.mxu1 %v90_v53  ;;  %354 = vmatprep.subr.mxu0 %v82_v54  ;;  %v257_v18 = vld [vmem:[%s1527_s3 + $0x5f0] sm:$0xff]  ;;  %v259_v19 = vld [vmem:[%s1527_s3 + $0x600] sm:$0xff]  ;;  %v256_v20 = vld [vmem:[%s1527_s3 + $0x5e8] sm:$0xff] }
  0x1d   :  { %425 = vmatprep.subr.mxu1 %v84_v55  ;;  %355 = vmatpush1.msra.mxu0 %v81_v56  ;;  %v258_v21 = vld [vmem:[%s1527_s3 + $0x5f8] sm:$0xff]  ;;  %v252_v23 = vld [vmem:[%s1527_s3 + $0x5c8] sm:$0xff]  ;;  %v249_v24 = vld [vmem:[%s1527_s3 + $0x5b0] sm:$0xff] }
  0x1e   :  { %426 = vmatpush1.msra.mxu1 %v83_v57  ;;  %356 = vmatprep.subr.mxu0 %v75_v58  ;;  %v250_v22 = vld [vmem:[%s1527_s3 + $0x5b8] sm:$0xff]  ;;  %v251_v25 = vld [vmem:[%s1527_s3 + $0x5c0] sm:$0xff]  ;;  %v245_v27 = vld [vmem:[%s1527_s3 + $0x590] sm:$0xff] }
  0x1f   :  { %427 = vmatprep.subr.mxu1 %v77_v59  ;;  %357 = vmatpush1.msra.mxu0 %v74_v60  ;;  %v243_v26 = vld [vmem:[%s1527_s3 + $0x580] sm:$0xff]  ;;  %v242_v28 = vld [vmem:[%s1527_s3 + $0x578] sm:$0xff]  ;;  %v244_v29 = vld [vmem:[%s1527_s3 + $0x588] sm:$0xff] }
  0x20   :  { %428 = vmatpush1.msra.mxu1 %v76_v61  ;;  %358 = vmatprep.subr.mxu0 %v68_v62  ;;  %v236_v30 = vld [vmem:[%s1527_s3 + $0x548] sm:$0xff]  ;;  %v238_v31 = vld [vmem:[%s1527_s3 + $0x558] sm:$0xff]  ;;  %v235_v32 = vld [vmem:[%s1527_s3 + $0x540] sm:$0xff] }
  0x21   :  { %429 = vmatprep.subr.mxu1 %v70_v63  ;;  %359 = vmatpush1.msra.mxu0 %v67_v0  ;;  %v237_v33 = vld [vmem:[%s1527_s3 + $0x550] sm:$0xff]  ;;  %v231_v35 = vld [vmem:[%s1527_s3 + $0x520] sm:$0xff]  ;;  %v228_v36 = vld [vmem:[%s1527_s3 + $0x508] sm:$0xff] }
  0x22   :  { %430 = vmatpush1.msra.mxu1 %v69_v1  ;;  %360 = vmatprep.subr.mxu0 %v285_v2  ;;  %v229_v34 = vld [vmem:[%s1527_s3 + $0x510] sm:$0xff]  ;;  %v230_v37 = vld [vmem:[%s1527_s3 + $0x518] sm:$0xff]  ;;  %v224_v39 = vld [vmem:[%s1527_s3 + $0x4e8] sm:$0xff] }
  0x23   :  { %431 = vmatprep.subr.mxu1 %v287_v3  ;;  %361 = vmatpush2.msra.mxu0 %v284_v4  ;;  %v222_v38 = vld [vmem:[%s1527_s3 + $0x4d8] sm:$0xff]  ;;  %v221_v40 = vld [vmem:[%s1527_s3 + $0x4d0] sm:$0xff]  ;;  %v223_v41 = vld [vmem:[%s1527_s3 + $0x4e0] sm:$0xff] }
  0x24   :  { %432 = vmatpush2.msra.mxu1 %v286_v5  ;;  %362 = vmatprep.subr.mxu0 %v278_v6  ;;  %v215_v42 = vld [vmem:[%s1527_s3 + $0x4a0] sm:$0xff]  ;;  %v217_v43 = vld [vmem:[%s1527_s3 + $0x4b0] sm:$0xff]  ;;  %v214_v44 = vld [vmem:[%s1527_s3 + $0x498] sm:$0xff] }
  0x25   :  { %433 = vmatprep.subr.mxu1 %v280_v7  ;;  %363 = vmatpush2.msra.mxu0 %v277_v8  ;;  %v216_v45 = vld [vmem:[%s1527_s3 + $0x4a8] sm:$0xff]  ;;  %v210_v47 = vld [vmem:[%s1527_s3 + $0x478] sm:$0xff]  ;;  %v207_v48 = vld [vmem:[%s1527_s3 + $0x460] sm:$0xff] }
  0x26   :  { %434 = vmatpush2.msra.mxu1 %v279_v9  ;;  %364 = vmatprep.subr.mxu0 %v271_v10  ;;  %v208_v46 = vld [vmem:[%s1527_s3 + $0x468] sm:$0xff]  ;;  %v209_v49 = vld [vmem:[%s1527_s3 + $0x470] sm:$0xff]  ;;  %v203_v51 = vld [vmem:[%s1527_s3 + $0x440] sm:$0xff] }
  0x27   :  { %435 = vmatprep.subr.mxu1 %v273_v11  ;;  %365 = vmatpush2.msra.mxu0 %v270_v12  ;;  %v201_v50 = vld [vmem:[%s1527_s3 + $0x430] sm:$0xff]  ;;  %v200_v52 = vld [vmem:[%s1527_s3 + $0x428] sm:$0xff]  ;;  %v202_v53 = vld [vmem:[%s1527_s3 + $0x438] sm:$0xff] }
  0x28   :  { %436 = vmatpush2.msra.mxu1 %v272_v13  ;;  %366 = vmatprep.subr.mxu0 %v264_v14  ;;  %v194_v54 = vld [vmem:[%s1527_s3 + $0x3f8] sm:$0xff]  ;;  %v196_v55 = vld [vmem:[%s1527_s3 + $0x408] sm:$0xff]  ;;  %v193_v56 = vld [vmem:[%s1527_s3 + $0x3f0] sm:$0xff] }
  0x29   :  { %437 = vmatprep.subr.mxu1 %v266_v15  ;;  %367 = vmatpush2.msra.mxu0 %v263_v16  ;;  %v195_v57 = vld [vmem:[%s1527_s3 + $0x400] sm:$0xff]  ;;  %v189_v59 = vld [vmem:[%s1527_s3 + $0x3d0] sm:$0xff] }
  0x2a   :  { %438 = vmatpush2.msra.mxu1 %v265_v17  ;;  %368 = vmatprep.subr.mxu0 %v257_v18  ;;  %v187_v58 = vld [vmem:[%s1527_s3 + $0x3c0] sm:$0xff] }
  0x2b   :  { %439 = vmatprep.subr.mxu1 %v259_v19  ;;  %369 = vmatpush2.msra.mxu0 %v256_v20 }
  0x2c   :  { %440 = vmatpush2.msra.mxu1 %v258_v21  ;;  %370 = vmatprep.subr.mxu0 %v250_v22 }
  0x2d   :  { %441 = vmatprep.subr.mxu1 %v252_v23  ;;  %371 = vmatpush2.msra.mxu0 %v249_v24 }
  0x2e   :  { %442 = vmatpush2.msra.mxu1 %v251_v25  ;;  %372 = vmatprep.subr.mxu0 %v243_v26 }
  0x2f   :  { %443 = vmatprep.subr.mxu1 %v245_v27  ;;  %373 = vmatpush2.msra.mxu0 %v242_v28 }
  0x30   :  { %444 = vmatpush2.msra.mxu1 %v244_v29  ;;  %374 = vmatprep.subr.mxu0 %v236_v30 }
  0x31   :  { %445 = vmatprep.subr.mxu1 %v238_v31  ;;  %375 = vmatpush2.msra.mxu0 %v235_v32 }
  0x32   :  { %446 = vmatpush2.msra.mxu1 %v237_v33  ;;  %376 = vmatprep.subr.mxu0 %v229_v34 }
  0x33   :  { %447 = vmatprep.subr.mxu1 %v231_v35  ;;  %377 = vmatpush2.msra.mxu0 %v228_v36 }
  0x34   :  { %448 = vmatpush2.msra.mxu1 %v230_v37  ;;  %378 = vmatprep.subr.mxu0 %v222_v38 }
  0x35   :  { %449 = vmatprep.subr.mxu1 %v224_v39  ;;  %379 = vmatpush2.msra.mxu0 %v221_v40 }
  0x36   :  { %450 = vmatpush2.msra.mxu1 %v223_v41  ;;  %380 = vmatprep.subr.mxu0 %v215_v42 }
  0x37   :  { %451 = vmatprep.subr.mxu1 %v217_v43  ;;  %381 = vmatpush2.msra.mxu0 %v214_v44 }
  0x38   :  { %452 = vmatpush2.msra.mxu1 %v216_v45  ;;  %382 = vmatprep.subr.mxu0 %v208_v46 }
  0x39   :  { %453 = vmatprep.subr.mxu1 %v210_v47  ;;  %383 = vmatpush2.msra.mxu0 %v207_v48 }
  0x3a   :  { %454 = vmatpush2.msra.mxu1 %v209_v49  ;;  %384 = vmatprep.subr.mxu0 %v201_v50 }
  0x3b   :  { %455 = vmatprep.subr.mxu1 %v203_v51  ;;  %385 = vmatpush2.msra.mxu0 %v200_v52 }
  0x3c   :  { %456 = vmatpush2.msra.mxu1 %v202_v53 }
  0x3d   :  { %10 = vsyncpa [#allocation3], 0  ;;  %386 = vmatprep.subr.mxu0 %v194_v54  ;;  %457 = vmatprep.subr.mxu1 %v196_v55  ;;  %v186_v60 = vld [vmem:[%s1527_s3 + $0x3b8] sm:$0xff]  ;;  %v188_v61 = vld [vmem:[%s1527_s3 + $0x3c8] sm:$0xff]  ;;  %v29_v4 = vlaneseq  ;;  %vm659_vm0 = vcmask 130048  }
  0x3e   :  { %387 = vmatpush2.msra.mxu0 %v193_v56  ;;  %458 = vmatpush2.msra.mxu1 %v195_v57  ;;  %v180_v62 = vld [vmem:[%s1527_s3 + $0x388] sm:$0xff]  ;;  %v182_v63 = vld [vmem:[%s1527_s3 + $0x398] sm:$0xff]  ;;  %v179_v0 = vld [vmem:[%s1527_s3 + $0x380] sm:$0xff] }
  0x3f   :  { %388 = vmatprep.subr.mxu0 %v187_v58  ;;  %459 = vmatprep.subr.mxu1 %v189_v59  ;;  %v181_v1 = vld [vmem:[%s1527_s3 + $0x390] sm:$0xff]  ;;  %v290_v3 = vld [vmem:[%s1527_s3 + $0x6f8] sm:$0xff]  ;;  %v1205_v5 = vshrl.u32 %v29_v4, 7  ;;  %v22_v8 = vld [vmem:[%s1525_s1] sm:$0x3] }
  0x40   :  { %389 = vmatpush2.msra.mxu0 %v186_v60  ;;  %460 = vmatpush2.msra.mxu1 %v188_v61  ;;  %v177_v2 = vld [vmem:[%s1527_s3 + $0x370] sm:$0xff]  ;;  %v41_v9 = vld [vmem:[%s1526_s2] sm:$0x3]  ;;  %v176_v27 = vld [vmem:[%s1527_s3 + $0x368] sm:$0xff] }
  0x41   :  { %390 = vmatprep.subr.mxu0 %v180_v62  ;;  %461 = vmatprep.subr.mxu1 %v182_v63  ;;  %v1208_v6 = vsub.s32 0, %v1205_v5  ;;  %v1211_v7 = vsub.s32 1, %v1205_v5  ;;  %v178_v28 = vld [vmem:[%s1527_s3 + $0x378] sm:$0xff]  ;;  %v283_v30 = vld [vmem:[%s1527_s3 + $0x6c0] sm:$0xff]  ;;  %v169_v31 = vld [vmem:[%s1527_s3 + $0x330] sm:$0xff] }
  0x42   :  { %391 = vmatpush2.msra.mxu0 %v179_v0  ;;  %462 = vmatpush2.msra.mxu1 %v181_v1  ;;  %v170_v29 = vld [vmem:[%s1527_s3 + $0x338] sm:$0xff]  ;;  %v171_v32 = vld [vmem:[%s1527_s3 + $0x340] sm:$0xff]  ;;  %v276_v34 = vld [vmem:[%s1527_s3 + $0x688] sm:$0xff] }
  0x43   :  { %470 = vmatprep.subr.mxu0 %v177_v2  ;;  %684 = vmatprep.subr.mxu1 %v290_v3  ;;  %v32_v10 = vrot.slane %v22_v8, %v1208_v6  ;;  %v36_v11 = vrot.slane %v22_v8, %v1211_v7  ;;  %v46_v12 = vrot.slane %v41_v9, %v1208_v6  ;;  %v163_v33 = vld [vmem:[%s1527_s3 + $0x300] sm:$0xff]  ;;  %v162_v35 = vld [vmem:[%s1527_s3 + $0x2f8] sm:$0xff]  ;;  %v164_v36 = vld [vmem:[%s1527_s3 + $0x308] sm:$0xff] }
  0x44   :  { %v50_v13 = vrot.slane %v41_v9, %v1211_v7  ;;  %v156_v37 = vld [vmem:[%s1527_s3 + $0x2c8] sm:$0xff]  ;;  %v269_v38 = vld [vmem:[%s1527_s3 + $0x650] sm:$0xff]  ;;  %v155_v39 = vld [vmem:[%s1527_s3 + $0x2c0] sm:$0xff] }
  0x45   :  { %v157_v40 = vld [vmem:[%s1527_s3 + $0x2d0] sm:$0xff]  ;;  %v262_v42 = vld [vmem:[%s1527_s3 + $0x618] sm:$0xff]  ;;  %v148_v43 = vld [vmem:[%s1527_s3 + $0x288] sm:$0xff] }
  0x46   :  { %v149_v41 = vld [vmem:[%s1527_s3 + $0x290] sm:$0xff]  ;;  %v150_v44 = vld [vmem:[%s1527_s3 + $0x298] sm:$0xff]  ;;  %v255_v46 = vld [vmem:[%s1527_s3 + $0x5e0] sm:$0xff] }
  0x47   :  { %v142_v45 = vld [vmem:[%s1527_s3 + $0x258] sm:$0xff]  ;;  %v141_v47 = vld [vmem:[%s1527_s3 + $0x250] sm:$0xff]  ;;  %v143_v48 = vld [vmem:[%s1527_s3 + $0x260] sm:$0xff] }
  0x48   :  { %v135_v49 = vld [vmem:[%s1527_s3 + $0x220] sm:$0xff]  ;;  %v248_v50 = vld [vmem:[%s1527_s3 + $0x5a8] sm:$0xff]  ;;  %v134_v51 = vld [vmem:[%s1527_s3 + $0x218] sm:$0xff] }
  0x49   :  { %v136_v52 = vld [vmem:[%s1527_s3 + $0x228] sm:$0xff]  ;;  %v241_v54 = vld [vmem:[%s1527_s3 + $0x570] sm:$0xff]  ;;  %v127_v55 = vld [vmem:[%s1527_s3 + $0x1e0] sm:$0xff] }
  0x4a   :  { %v128_v53 = vld [vmem:[%s1527_s3 + $0x1e8] sm:$0xff]  ;;  %v129_v56 = vld [vmem:[%s1527_s3 + $0x1f0] sm:$0xff]  ;;  %v234_v58 = vld [vmem:[%s1527_s3 + $0x538] sm:$0xff] }
  0x4b   :  { %v121_v57 = vld [vmem:[%s1527_s3 + $0x1b0] sm:$0xff]  ;;  %v120_v59 = vld [vmem:[%s1527_s3 + $0x1a8] sm:$0xff]  ;;  %v122_v60 = vld [vmem:[%s1527_s3 + $0x1b8] sm:$0xff] }
  0x4c   :  { %v114_v61 = vld [vmem:[%s1527_s3 + $0x178] sm:$0xff]  ;;  %v227_v62 = vld [vmem:[%s1527_s3 + $0x500] sm:$0xff]  ;;  %v113_v63 = vld [vmem:[%s1527_s3 + $0x170] sm:$0xff] }
  0x4d   :  { %v115_v0 = vld [vmem:[%s1527_s3 + $0x180] sm:$0xff]  ;;  %v220_v2 = vld [vmem:[%s1527_s3 + $0x4c8] sm:$0xff]  ;;  %v106_v3 = vld [vmem:[%s1527_s3 + $0x138] sm:$0xff] }
  0x4e   :  { %v107_v1 = vld [vmem:[%s1527_s3 + $0x140] sm:$0xff]  ;;  %v108_v4 = vld [vmem:[%s1527_s3 + $0x148] sm:$0xff]  ;;  %v213_v9 = vld [vmem:[%s1527_s3 + $0x490] sm:$0xff] }
  0x4f   :  { %v100_v8 = vld [vmem:[%s1527_s3 + $0x108] sm:$0xff] }
  0x7d   :  { %v26_v14 = vpop.permute.xlu0 %25 }
  0x7e   :  { %v39_v15 = vmul.f32 %v32_v10, %v26_v14  ;;  %v40_v16 = vmul.f32 %v36_v11, %v26_v14  ;;  %v99_v10 = vld [vmem:[%s1527_s3 + $0x100] sm:$0xff]  ;;  %v101_v11 = vld [vmem:[%s1527_s3 + $0x110] sm:$0xff]  ;;  %v92_v14 = vld [vmem:[%s1527_s3 + $0xc8] sm:$0xff] }
  0x80   :  { %v53_v17 = vadd.f32 %v46_v12, %v39_v15  ;;  %v54_v18 = vadd.f32 %v50_v13, %v40_v16  ;;  %v93_v12 = vld [vmem:[%s1527_s3 + $0xd0] sm:$0xff]  ;;  %v206_v13 = vld [vmem:[%s1527_s3 + $0x458] sm:$0xff] }
  0x81   :  { %v94_v15 = vld [vmem:[%s1527_s3 + $0xd8] sm:$0xff] }
  0x82   :  { %v675_v19 = vmul.f32 -1.442695, %v53_v17  ;;  %v676_v20 = vmul.f32 -1.442695, %v54_v18  ;;  %v86_v16 = vld [vmem:[%s1527_s3 + $0x98] sm:$0xff]  ;;  %v199_v17 = vld [vmem:[%s1527_s3 + $0x420] sm:$0xff] }
  0x83   :  { %v85_v18 = vld [vmem:[%s1527_s3 + $0x90] sm:$0xff] }
  0x84   :  { %722 = vpow2.f32 %v675_v19  ;;  %v87_v19 = vld [vmem:[%s1527_s3 + $0xa0] sm:$0xff] }
  0x85   :  { %724 = vpow2.f32 %v676_v20  ;;  %v79_v20 = vld [vmem:[%s1527_s3 + $0x60] sm:$0xff] }
  0x91   :  { %v723_v21 = vpop.eup %722 }
  0x92   :  { %v725_v22 = vpop.eup %724  ;;  %v61_v23 = vadd.f32 1.0, %v723_v21  ;;  %v192_v21 = vld [vmem:[%s1527_s3 + $0x3e8] sm:$0xff] }
  0x93   :  { %v62_v24 = vadd.f32 1.0, %v725_v22  ;;  %v78_v22 = vld [vmem:[%s1527_s3 + $0x58] sm:$0xff] }
  0x94   :  { %726 = vrcp.f32 %v61_v23  ;;  %v80_v23 = vld [vmem:[%s1527_s3 + $0x68] sm:$0xff] }
  0x95   :  { %728 = vrcp.f32 %v62_v24  ;;  %v72_v24 = vld [vmem:[%s1527_s3 + $0x28] sm:$0xff] }
  0xa1   :  { %v1223_v25 = vpop.eup %726 }
  0xa2   :  { %v729_v26 = vpop.eup %728 }
  0xa3   :  { %392 = vmatprep.mubr.f32.mxu0 %v729_v26  ;;  %463 = vmatprep.mubr.f32.mxu1 %v729_v26 }
  0xa4   :  { %393 = vmatmul.mubr.f32.vlgmr.msra.gmra.mxu0 %v1223_v25  ;;  %464 = vmatmul.mubr.f32.vlgmr.msra.gmra.mxu1 %v1223_v25 }
  0xa5   :  { %471 = vmatpush1.msra.mxu0 %v176_v27  ;;  %685 = vmatpush3.msra.mxu1 %v178_v28  ;;  %v71_v27 = vld [vmem:[%s1527_s3 + $0x20] sm:$0xff]  ;;  %v73_v28 = vld [vmem:[%s1527_s3 + $0x30] sm:$0xff] }
  0xa6   :  { %472 = vmatprep.subr.mxu0 %v170_v29  ;;  %534 = vmatprep.mubr.f32.mxu0 %v729_v26  ;;  %v289_v29 = vld [vmem:[%s1527_s3 + $0x6f0] sm:$0xff] }
  0xa7   :  { %686 = vmatprep.subr.mxu1 %v283_v30  ;;  %605 = vmatprep.mubr.f32.mxu1 %v729_v26  ;;  %v185_v26 = vld [vmem:[%s1527_s3 + $0x3b0] sm:$0xff]  ;;  %v288_v30 = vld [vmem:[%s1527_s3 + $0x6e8] sm:$0xff] }
  0xa8   :  { %473 = vmatpush1.msra.mxu0 %v169_v31  ;;  %687 = vmatpush3.msra.mxu1 %v171_v32  ;;  %v282_v31 = vld [vmem:[%s1527_s3 + $0x6b8] sm:$0xff]  ;;  %v281_v32 = vld [vmem:[%s1527_s3 + $0x6b0] sm:$0xff] }
  0xa9   :  { %474 = vmatprep.subr.mxu0 %v163_v33  ;;  %688 = vmatprep.subr.mxu1 %v276_v34  ;;  %v275_v33 = vld [vmem:[%s1527_s3 + $0x680] sm:$0xff]  ;;  %v274_v34 = vld [vmem:[%s1527_s3 + $0x678] sm:$0xff] }
  0xaa   :  { %475 = vmatpush1.msra.mxu0 %v162_v35  ;;  %689 = vmatpush3.msra.mxu1 %v164_v36  ;;  %v268_v35 = vld [vmem:[%s1527_s3 + $0x648] sm:$0xff]  ;;  %v267_v36 = vld [vmem:[%s1527_s3 + $0x640] sm:$0xff] }
  0xab   :  { %476 = vmatprep.subr.mxu0 %v156_v37  ;;  %690 = vmatprep.subr.mxu1 %v269_v38  ;;  %v261_v37 = vld [vmem:[%s1527_s3 + $0x610] sm:$0xff]  ;;  %v260_v38 = vld [vmem:[%s1527_s3 + $0x608] sm:$0xff] }
  0xac   :  { %477 = vmatpush1.msra.mxu0 %v155_v39  ;;  %691 = vmatpush3.msra.mxu1 %v157_v40  ;;  %v254_v39 = vld [vmem:[%s1527_s3 + $0x5d8] sm:$0xff]  ;;  %v253_v40 = vld [vmem:[%s1527_s3 + $0x5d0] sm:$0xff] }
  0xad   :  { %478 = vmatprep.subr.mxu0 %v149_v41  ;;  %692 = vmatprep.subr.mxu1 %v262_v42  ;;  %v247_v41 = vld [vmem:[%s1527_s3 + $0x5a0] sm:$0xff]  ;;  %v246_v42 = vld [vmem:[%s1527_s3 + $0x598] sm:$0xff] }
  0xae   :  { %479 = vmatpush1.msra.mxu0 %v148_v43  ;;  %693 = vmatpush3.msra.mxu1 %v150_v44  ;;  %v240_v43 = vld [vmem:[%s1527_s3 + $0x568] sm:$0xff]  ;;  %v239_v44 = vld [vmem:[%s1527_s3 + $0x560] sm:$0xff] }
  0xaf   :  { %480 = vmatprep.subr.mxu0 %v142_v45  ;;  %694 = vmatprep.subr.mxu1 %v255_v46  ;;  %v233_v45 = vld [vmem:[%s1527_s3 + $0x530] sm:$0xff]  ;;  %v232_v46 = vld [vmem:[%s1527_s3 + $0x528] sm:$0xff] }
  0xb0   :  { %481 = vmatpush1.msra.mxu0 %v141_v47  ;;  %695 = vmatpush3.msra.mxu1 %v143_v48  ;;  %v226_v47 = vld [vmem:[%s1527_s3 + $0x4f8] sm:$0xff]  ;;  %v225_v48 = vld [vmem:[%s1527_s3 + $0x4f0] sm:$0xff] }
  0xb1   :  { %482 = vmatprep.subr.mxu0 %v135_v49  ;;  %696 = vmatprep.subr.mxu1 %v248_v50  ;;  %v219_v49 = vld [vmem:[%s1527_s3 + $0x4c0] sm:$0xff]  ;;  %v218_v50 = vld [vmem:[%s1527_s3 + $0x4b8] sm:$0xff] }
  0xb2   :  { %483 = vmatpush1.msra.mxu0 %v134_v51  ;;  %697 = vmatpush3.msra.mxu1 %v136_v52  ;;  %v212_v51 = vld [vmem:[%s1527_s3 + $0x488] sm:$0xff]  ;;  %v211_v52 = vld [vmem:[%s1527_s3 + $0x480] sm:$0xff] }
  0xb3   :  { %484 = vmatprep.subr.mxu0 %v128_v53  ;;  %698 = vmatprep.subr.mxu1 %v241_v54  ;;  %v205_v53 = vld [vmem:[%s1527_s3 + $0x450] sm:$0xff]  ;;  %v204_v54 = vld [vmem:[%s1527_s3 + $0x448] sm:$0xff] }
  0xb4   :  { %485 = vmatpush1.msra.mxu0 %v127_v55  ;;  %699 = vmatpush3.msra.mxu1 %v129_v56  ;;  %v198_v55 = vld [vmem:[%s1527_s3 + $0x418] sm:$0xff]  ;;  %v197_v56 = vld [vmem:[%s1527_s3 + $0x410] sm:$0xff] }
  0xb5   :  { %486 = vmatprep.subr.mxu0 %v121_v57  ;;  %700 = vmatprep.subr.mxu1 %v234_v58  ;;  %v191_v57 = vld [vmem:[%s1527_s3 + $0x3e0] sm:$0xff]  ;;  %v190_v58 = vld [vmem:[%s1527_s3 + $0x3d8] sm:$0xff] }
  0xb6   :  { %487 = vmatpush1.msra.mxu0 %v120_v59  ;;  %701 = vmatpush3.msra.mxu1 %v122_v60  ;;  %v184_v59 = vld [vmem:[%s1527_s3 + $0x3a8] sm:$0xff]  ;;  %v183_v60 = vld [vmem:[%s1527_s3 + $0x3a0] sm:$0xff]  ;;  %s781_s3 = smov [#allocation2]  }
  0xb7   :  { %488 = vmatprep.subr.mxu0 %v114_v61  ;;  %702 = vmatprep.subr.mxu1 %v227_v62  ;;  %v303_v61 = vsub.s32 2, %v1205_v5  ;;  %v291_v62 = vld [vmem:[%s1528_s4] sm:$0x7f]  ;;  %s667_s4 = sshll.u32 %s781_s3, 4  ;;  %s668_s4 = int_to_ptr.vmem [resolvable:$true] %s667_s4 }
  0xb8   :  { %489 = vmatpush1.msra.mxu0 %v113_v63  ;;  %703 = vmatpush3.msra.mxu1 %v115_v0  ;;  %v307_v63 = vsub.s32 3, %v1205_v5  ;;  %v296_v0 = vrot.slane %v291_v62, %v1208_v6  ;;  %s758_s18 = scalar_lea.vmem %s668_s4, 896  ;;  %p763_p1 = scmp.lt.s32.totalorder %s668_s4, %s668_s4 }
  0xb9   :  { %490 = vmatprep.subr.mxu0 %v107_v1  ;;  %704 = vmatprep.subr.mxu1 %v220_v2  ;;  %v304_v1 = vrot.slane %v291_v62, %v303_v61  ;;  %v300_v2 = vrot.slane %v291_v62, %v1211_v7  ;;  %p759_p0 = scmp.ne.s32.totalorder %s668_s4, %s758_s18  ;;  %p764_p2 = scmp.lt.s32.totalorder %s758_s18, %s758_s18 }
  0xba   :  { %491 = vmatpush1.msra.mxu0 %v106_v3  ;;  %705 = vmatpush3.msra.mxu1 %v108_v4  ;;  %v308_v3 = vrot.slane %v291_v62, %v307_v63 }
  0xbb   :  { %492 = vmatprep.subr.mxu0 %v100_v8  ;;  %706 = vmatprep.subr.mxu1 %v213_v9  ;;  %p765_p3 = por %p764_p2, %p763_p1 }
  0xbc   :  { %493 = vmatpush1.msra.mxu0 %v99_v10  ;;  %707 = vmatpush3.msra.mxu1 %v101_v11 }
  0xbd   :  { %494 = vmatprep.subr.mxu0 %v93_v12  ;;  %708 = vmatprep.subr.mxu1 %v206_v13  ;;  %p766_p4 = pnand %p765_p3, %p759_p0 }
  0xbe   :  { %495 = vmatpush1.msra.mxu0 %v92_v14  ;;  %709 = vmatpush3.msra.mxu1 %v94_v15 }
  0xbf   :  { %496 = vmatprep.subr.mxu0 %v86_v16  ;;  %710 = vmatprep.subr.mxu1 %v199_v17 }
  0xc0   :  { %497 = vmatpush1.msra.mxu0 %v85_v18  ;;  %711 = vmatpush3.msra.mxu1 %v87_v19 }
  0xc1   :  { %498 = vmatprep.subr.mxu0 %v79_v20  ;;  %712 = vmatprep.subr.mxu1 %v192_v21 }
  0xc2   :  { %499 = vmatpush1.msra.mxu0 %v78_v22  ;;  %713 = vmatpush3.msra.mxu1 %v80_v23 }
  0xc3   :  { %500 = vmatprep.subr.mxu0 %v72_v24  ;;  %714 = vmatprep.subr.mxu1 %v185_v26  ;;  %v319_v24 = vsub.s32 6, %v1205_v5 }
  0xc4   :  { %501 = vmatpush1.msra.mxu0 %v71_v27  ;;  %715 = vmatpush3.msra.mxu1 %v73_v28 }
  0xc5   :  { %502 = vmatprep.subr.mxu0 %v289_v29  ;;  %606 = vmatmul.mubr.f32.vlgmr.msra.gmra.mxu1 %v1223_v25  ;;  %v320_v28 = vrot.slane %v291_v62, %v319_v24 }
  0xc6   :  { %503 = vmatpush2.msra.mxu0 %v288_v30 }
  0xc7   :  { %504 = vmatprep.subr.mxu0 %v282_v31 }
  0xc8   :  { %505 = vmatpush2.msra.mxu0 %v281_v32 }
  0xc9   :  { %506 = vmatprep.subr.mxu0 %v275_v33 }
  0xca   :  { %507 = vmatpush2.msra.mxu0 %v274_v34 }
  0xcb   :  { %508 = vmatprep.subr.mxu0 %v268_v35 }
  0xcc   :  { %509 = vmatpush2.msra.mxu0 %v267_v36 }
  0xcd   :  { %510 = vmatprep.subr.mxu0 %v261_v37 }
  0xce   :  { %511 = vmatpush2.msra.mxu0 %v260_v38  ;;  %v311_v38 = vsub.s32 4, %v1205_v5 }
  0xcf   :  { %512 = vmatprep.subr.mxu0 %v254_v39  ;;  %v315_v39 = vsub.s32 5, %v1205_v5 }
  0xd0   :  { %513 = vmatpush2.msra.mxu0 %v253_v40  ;;  %v312_v40 = vrot.slane %v291_v62, %v311_v38 }
  0xd1   :  { %514 = vmatprep.subr.mxu0 %v247_v41  ;;  %v316_v41 = vrot.slane %v291_v62, %v315_v39 }
  0xd2   :  { %515 = vmatpush2.msra.mxu0 %v246_v42 }
  0xd3   :  { %516 = vmatprep.subr.mxu0 %v240_v43 }
  0xd4   :  { %517 = vmatpush2.msra.mxu0 %v239_v44 }
  0xd5   :  { %518 = vmatprep.subr.mxu0 %v233_v45 }
  0xd6   :  { %519 = vmatpush2.msra.mxu0 %v232_v46 }
  0xd7   :  { %520 = vmatprep.subr.mxu0 %v226_v47 }
  0xd8   :  { %521 = vmatpush2.msra.mxu0 %v225_v48 }
  0xd9   :  { %522 = vmatprep.subr.mxu0 %v219_v49 }
  0xda   :  { %523 = vmatpush2.msra.mxu0 %v218_v50 }
  0xdb   :  { %524 = vmatprep.subr.mxu0 %v212_v51 }
  0xdc   :  { %525 = vmatpush2.msra.mxu0 %v211_v52 }
  0xdd   :  { %526 = vmatprep.subr.mxu0 %v205_v53 }
  0xde   :  { %527 = vmatpush2.msra.mxu0 %v204_v54 }
  0xdf   :  { %528 = vmatprep.subr.mxu0 %v198_v55 }
  0xe0   :  { %529 = vmatpush2.msra.mxu0 %v197_v56 }
  0xe1   :  { %530 = vmatprep.subr.mxu0 %v191_v57 }
  0xe2   :  { %531 = vmatpush2.msra.mxu0 %v190_v58 }
  0xe3   :  { %532 = vmatprep.subr.mxu0 %v184_v59 }
  0xe4   :  { %533 = vmatpush2.msra.mxu0 %v183_v60 }
  0xe5   :  { %535 = vmatmul.mubr.f32.vlgmr.msra.gmra.mxu0 %v1223_v25 }
 0x164   :  { %v394_v4 = vpop.f32.mrf.mxu0  ;;  %v465_v8 = vpop.f32.mrf.mxu1 }
 0x165   :  { %v395_v9 = vadd.f32 %v394_v4, %v296_v0  ;;  %v466_v10 = vadd.f32 %v465_v8, %v304_v1 }
 0x166   :  { %v396_v11 = vpop.f32.mrf.mxu0  ;;  %v467_v25 = vpop.f32.mrf.mxu1 }
 0x167   :  { %v677_v12 = vmul.f32 -1.442695, %v395_v9  ;;  %v679_v13 = vmul.f32 -1.442695, %v466_v10  ;;  %v397_v14 = vadd.f32 %v396_v11, %v300_v2  ;;  %v468_v15 = vadd.f32 %v467_v25, %v308_v3 }
 0x169   :  { %730 = vpow2.f32 %v677_v12  ;;  %v678_v16 = vmul.f32 -1.442695, %v397_v14  ;;  %v680_v17 = vmul.f32 -1.442695, %v468_v15 }
 0x16a   :  { %732 = vpow2.f32 %v679_v13 }
 0x16b   :  { %734 = vpow2.f32 %v678_v16 }
 0x16c   :  { %736 = vpow2.f32 %v680_v17 }
 0x176   :  { %v731_v6 = vpop.eup %730 }
 0x177   :  { %v733_v18 = vpop.eup %732  ;;  %v632_v7 = vadd.f32 1.0, %v731_v6 }
 0x178   :  { %v735_v19 = vpop.eup %734  ;;  %v634_v20 = vadd.f32 1.0, %v733_v18 }
 0x179   :  { %v737_v21 = vpop.eup %736  ;;  %738 = vrcp.f32 %v632_v7  ;;  %v633_v22 = vadd.f32 1.0, %v735_v19 }
 0x17a   :  { %740 = vrcp.f32 %v634_v20  ;;  %v635_v23 = vadd.f32 1.0, %v737_v21 }
 0x17b   :  { %742 = vrcp.f32 %v633_v22 }
 0x17c   :  { %744 = vrcp.f32 %v635_v23 }
 0x185   :  { %v716_v26 = vpop.f32.mrf.mxu1 }
 0x186   :  { %v739_v27 = vpop.eup %738 }
 0x187   :  { %v741_v29 = vpop.eup %740  ;;  %653 = vst [vmem:[#allocation2] sm:$0xff] %v739_v27  ;;  %v717_v30 = vpop.f32.mrf.mxu1 }
 0x188   :  { %v743_v31 = vpop.eup %742  ;;  %655 = vst [vmem:[#allocation2 + $0x10] sm:$0xff] %v741_v29  ;;  %v718_v32 = vadd.f32 %v717_v30, %v716_v26 }
 0x189   :  { %v745_v33 = vpop.eup %744  ;;  %654 = vst [vmem:[#allocation2 + $0x8] sm:$0xff] %v743_v31 }
 0x18a   :  { %656 = vst [vmem:[#allocation2 + $0x18] sm:$0xff] %v745_v33  ;;  %v608_v34 = vadd.f32 %v718_v32, %v320_v28 }
 0x18c   :  { %v683_v35 = vmul.f32 -1.442695, %v608_v34 }
 0x18e   :  { %746 = vpow2.f32 %v683_v35 }
 0x19b   :  { %v747_v36 = vpop.eup %746 }
 0x19c   :  { %v638_v37 = vadd.f32 1.0, %v747_v36 }
 0x19e   :  { %748 = vrcp.f32 %v638_v37 }
 0x1a5   :  { %v536_v42 = vpop.f32.mrf.mxu0 }
 0x1a6   :  { %v537_v43 = vadd.f32 %v536_v42, %v312_v40 }
 0x1a7   :  { %v538_v44 = vpop.f32.mrf.mxu0 }
 0x1a8   :  { %v681_v45 = vmul.f32 -1.442695, %v537_v43  ;;  %v539_v46 = vadd.f32 %v538_v44, %v316_v41 }
 0x1aa   :  { %750 = vpow2.f32 %v681_v45  ;;  %v682_v47 = vmul.f32 -1.442695, %v539_v46 }
 0x1ab   :  { %v749_v48 = vpop.eup %748 }
 0x1ac   :  { %752 = vpow2.f32 %v682_v47  ;;  %660 = vst.msk [vmem:[#allocation2 + $0x30] sm:$0xff] %vm659_vm0, %v749_v48 }
 0x1b7   :  { %v751_v49 = vpop.eup %750 }
 0x1b8   :  { %v636_v50 = vadd.f32 1.0, %v751_v49 }
 0x1b9   :  { %v753_v51 = vpop.eup %752 }
 0x1ba   :  { %754 = vrcp.f32 %v636_v50  ;;  %v637_v52 = vadd.f32 1.0, %v753_v51 }
 0x1bc   :  { %756 = vrcp.f32 %v637_v52 }
 0x1c7   :  { %v755_v5 = vpop.eup %754 }
 0x1c8   :  { %657 = vst [vmem:[#allocation2 + $0x20] sm:$0xff] %v755_v5 }
 0x1c9   :  { %v757_v53 = vpop.eup %756 }
 0x1ca   :  { %658 = vst [vmem:[#allocation2 + $0x28] sm:$0xff] %v757_v53 }
 0x1cb   :  { %769 = shalt.err (!%p766_p4)
}
 0x1cc   :  { %670 = dma.vmem_to_hbm [thread:$0]  %s668_s4, 896, %s1529_s5, [#allocation3]  }
 0x1cd   :  { %778 = dma.done.wait [#allocation3], 896  }
 0x1ce   :  { %779 = vsyncadd [#allocation3], 4294966400 }
 0x1cf   :  { %674 = vsyncpa [#allocation3], 1 }

</bundles_post_ra>
